<compile_context>
chip_gen: v7x
topology: tpu7x:2x2x1
jax: 0.10.0
libtpu: 0.0.40
codegen_flags: <defaults>
</compile_context>

<pallas_src>
import jax
import jax.numpy as jnp
from jax.experimental import pallas as pl
from jax.experimental.pallas import tpu as pltpu


def _round_up(v, m):
    return ((v + m - 1) // m) * m


def _mlp_kernel(x_ref, w1_ref, b1_ref, w2_ref, b2_ref, o_ref):
    # x:  [TB, OBS]        w1: [OBS, H]    b1: [1, H]
    # w2: [H, A_pad]       b2: [1, A_pad]  o:  [TB, A_pad]
    x = x_ref[...]

    # Linear 1: x @ w1 + b1   (MXU, f32 accumulation)
    h = jnp.dot(x, w1_ref[...], preferred_element_type=jnp.float32) + b1_ref[...]

    # LeakyReLU (torch default negative_slope = 0.01)  (VPU — rides free slots)
    h = jnp.where(h >= 0, h, 0.01 * h)

    # Linear 2: h @ w2 + b2   (MXU) — output tile is a full 128-lane slab,
    # so the store is an unmasked vst (lane-dense output).
    out = jnp.dot(h, w2_ref[...], preferred_element_type=jnp.float32) + b2_ref[...]

    o_ref[...] = out.astype(o_ref.dtype)


def generic_neural_network_forward(x, w1, b1, w2, b2, *, block_batch=512):
    """Forward pass of the 2-layer policy MLP as a single batched Pallas kernel.

    x : [B, OBS] float32
    w1: [H, OBS], b1: [H]        (PyTorch Linear layout: [out, in])
    w2: [A, H],  b2: [A]
    returns [B, A] float32 logits
    """
    B, OBS = x.shape
    H = w1.shape[0]
    A = w2.shape[0]

    # --- weight preparation (done once; constant-folded under jit) -------------
    # Pre-transpose to [K, N] so the kernel contracts x's lane axis against the
    # sublane axis of the weight — clean MXU feed, no in-kernel transpose.
    w1_t = jnp.asarray(w1, jnp.float32).T                                 # [OBS, H]
    # Lane-dense output: pad the action dim to a multiple of 128 lanes.
    A_pad = _round_up(max(A, 128), 128)
    w2_t = jnp.zeros((H, A_pad), jnp.float32).at[:, :A].set(
        jnp.asarray(w2, jnp.float32).T)                                   # [H, A_pad]
    b1_2d = jnp.asarray(b1, jnp.float32).reshape(1, H)
    b2_2d = jnp.zeros((1, A_pad), jnp.float32).at[:, :A].set(
        jnp.asarray(b2, jnp.float32).reshape(1, A))

    # --- batch tiling -----------------------------------------------------------
    # Stream the batch over a grid; weights/biases stay resident in VMEM.
    TB = block_batch if B >= block_batch else _round_up(B, 8)
    B_pad = _round_up(B, TB)
    x_p = jnp.asarray(x, jnp.float32)
    if B_pad != B:
        x_p = jnp.zeros((B_pad, OBS), jnp.float32).at[:B].set(x_p)

    grid = (B_pad // TB,)

    out = pl.pallas_call(
        _mlp_kernel,
        out_shape=jax.ShapeDtypeStruct((B_pad, A_pad), jnp.float32),
        grid=grid,
        in_specs=[
            pl.BlockSpec((TB, OBS), lambda i: (i, 0)),      # x: streams over batch
            pl.BlockSpec((OBS, H), lambda i: (0, 0)),       # w1_t: resident
            pl.BlockSpec((1, H), lambda i: (0, 0)),         # b1: resident
            pl.BlockSpec((H, A_pad), lambda i: (0, 0)),     # w2_t: resident
            pl.BlockSpec((1, A_pad), lambda i: (0, 0)),     # b2: resident
        ],
        out_specs=pl.BlockSpec((TB, A_pad), lambda i: (i, 0)),
        compiler_params=pltpu.CompilerParams(
            dimension_semantics=("parallel",),              # v7x: both TCs split batch
            vmem_limit_bytes=32 * 1024 * 1024,              # safe on v7x's 64 MiB VMEM
        ),
    )(x_p, w1_t, b1_2d, w2_t, b2_2d)

    # Slice off batch padding and the lane padding of the action dim.
    return out[:B, :A]


def init_params(key, observation_size, hidden_dimension_size, action_dimension_size):
    """Deterministic PyTorch-style (Kaiming-uniform-ish) init for the two Linears."""
    k1, k2, k3, k4 = jax.random.split(key, 4)
    bound1 = 1.0 / jnp.sqrt(observation_size)
    bound2 = 1.0 / jnp.sqrt(hidden_dimension_size)
    w1 = jax.random.uniform(k1, (hidden_dimension_size, observation_size),
                            jnp.float32, -bound1, bound1)
    b1 = jax.random.uniform(k2, (hidden_dimension_size,), jnp.float32, -bound1, bound1)
    w2 = jax.random.uniform(k3, (action_dimension_size, hidden_dimension_size),
                            jnp.float32, -bound2, bound2)
    b2 = jax.random.uniform(k4, (action_dimension_size,), jnp.float32, -bound2, bound2)
    return w1, b1, w2, b2


def _reference(x, w1, b1, w2, b2):
    h = x @ w1.T + b1
    h = jnp.where(h >= 0, h, 0.01 * h)
    return h @ w2.T + b2


if __name__ == "__main__":
    # CartPole-like sizes: observation=4, hidden=32, actions=2.
    OBS, HID, ACT = 4, 32, 2

    key = jax.random.PRNGKey(0)
    kx, kx2, kp = jax.random.split(key, 3)
    w1, b1, w2, b2 = init_params(kp, OBS, HID, ACT)

    # 1) Small single-episode batch (grid of 1 tile).
    x_small = jax.random.normal(kx, (8, OBS), jnp.float32)
    out_small = jax.block_until_ready(
        generic_neural_network_forward(x_small, w1, b1, w2, b2))
    ref_small = _reference(x_small, w1, b1, w2, b2)
    assert out_small.shape == (8, ACT)
    assert jnp.allclose(out_small, ref_small, atol=1e-5), "small-batch mismatch"

    # 2) Batched CEM-population / many-env-steps style call (exercises the grid:
    #    1024 rows -> two 512-row tiles streamed while weights stay in VMEM).
    x_big = jax.random.normal(kx2, (1024, OBS), jnp.float32)
    out_big = jax.block_until_ready(
        generic_neural_network_forward(x_big, w1, b1, w2, b2))
    ref_big = _reference(x_big, w1, b1, w2, b2)
    assert out_big.shape == (1024, ACT)
    assert jnp.allclose(out_big, ref_big, atol=1e-5), "batched mismatch"

    print("KERNEL_OK")
</pallas_src>

<mosaic_0001>
module attributes {stable_mosaic.version = 11 : i64} {
  func.func @_mlp_kernel(%arg0: i32, %arg1: memref<8x4xf32, #tpu.memory_space<vmem>>, %arg2: memref<4x32xf32, #tpu.memory_space<vmem>>, %arg3: memref<1x32xf32, #tpu.memory_space<vmem>>, %arg4: memref<32x128xf32, #tpu.memory_space<vmem>>, %arg5: memref<1x128xf32, #tpu.memory_space<vmem>>, %arg6: memref<8x128xf32, #tpu.memory_space<vmem>>) attributes {dimension_semantics = [#tpu.dimension_semantics<parallel>], iteration_bounds = array<i64: 1>, scalar_prefetch = 0 : i64, scratch_operands = 0 : i64, tpu.core_type = #tpu.core_type<tc>, window_params = [{transform_indices = @transform_0, window_bounds = array<i64: 8, 4>}, {pipeline_mode = #tpu.pipeline_mode<synchronous>, transform_indices = @transform_1, window_bounds = array<i64: 4, 32>}, {pipeline_mode = #tpu.pipeline_mode<synchronous>, transform_indices = @transform_2, window_bounds = array<i64: 1, 32>}, {pipeline_mode = #tpu.pipeline_mode<synchronous>, transform_indices = @transform_3, window_bounds = array<i64: 32, 128>}, {pipeline_mode = #tpu.pipeline_mode<synchronous>, transform_indices = @transform_4, window_bounds = array<i64: 1, 128>}, {transform_indices = @transform_5, window_bounds = array<i64: 8, 128>}]} {
    %c0 = arith.constant 0 : index
    %c0_0 = arith.constant 0 : index
    %0 = vector.load %arg1[%c0, %c0_0] : memref<8x4xf32, #tpu.memory_space<vmem>>, vector<8x4xf32>
    %c0_1 = arith.constant 0 : index
    %c0_2 = arith.constant 0 : index
    %1 = vector.load %arg2[%c0_1, %c0_2] : memref<4x32xf32, #tpu.memory_space<vmem>>, vector<4x32xf32>
    %cst = arith.constant dense<0.000000e+00> : vector<8x32xf32>
    %2 = tpu.matmul %0, %1, %cst {dimension_numbers = #tpu.dot_dimension_numbers<[1], [0], [0], [1], [0, 0, 1, 1], [], []>} : vector<8x4xf32>, vector<4x32xf32>, vector<8x32xf32> -> vector<8x32xf32>
    %c0_3 = arith.constant 0 : index
    %c0_4 = arith.constant 0 : index
    %3 = vector.load %arg3[%c0_3, %c0_4] : memref<1x32xf32, #tpu.memory_space<vmem>>, vector<1x32xf32>
    %4 = vector.broadcast %3 : vector<1x32xf32> to vector<8x32xf32>
    %5 = arith.addf %2, %4 : vector<8x32xf32>
    %cst_5 = arith.constant 0.000000e+00 : f32
    %6 = vector.broadcast %cst_5 : f32 to vector<8x32xf32>
    %7 = arith.cmpf oge, %5, %6 : vector<8x32xf32>
    %cst_6 = arith.constant 0.00999999977 : f32
    %8 = vector.broadcast %cst_6 : f32 to vector<8x32xf32>
    %9 = arith.mulf %8, %5 : vector<8x32xf32>
    %10 = arith.select %7, %5, %9 : vector<8x32xi1>, vector<8x32xf32>
    %c0_7 = arith.constant 0 : index
    %c0_8 = arith.constant 0 : index
    %11 = vector.load %arg4[%c0_7, %c0_8] : memref<32x128xf32, #tpu.memory_space<vmem>>, vector<32x128xf32>
    %cst_9 = arith.constant dense<0.000000e+00> : vector<8x128xf32>
    %12 = tpu.matmul %10, %11, %cst_9 {dimension_numbers = #tpu.dot_dimension_numbers<[1], [0], [0], [1], [0, 0, 1, 1], [], []>} : vector<8x32xf32>, vector<32x128xf32>, vector<8x128xf32> -> vector<8x128xf32>
    %c0_10 = arith.constant 0 : index
    %c0_11 = arith.constant 0 : index
    %13 = vector.load %arg5[%c0_10, %c0_11] : memref<1x128xf32, #tpu.memory_space<vmem>>, vector<1x128xf32>
    %14 = vector.broadcast %13 : vector<1x128xf32> to vector<8x128xf32>
    %15 = arith.addf %12, %14 : vector<8x128xf32>
    %c0_12 = arith.constant 0 : index
    %c0_13 = arith.constant 0 : index
    %16 = vector.load %arg6[%c0_12, %c0_13] : memref<8x128xf32, #tpu.memory_space<vmem>>, vector<8x128xf32>
    tpu.vector_store %arg6[%c0_12, %c0_13], %15 {strides = array<i32>} : memref<8x128xf32, #tpu.memory_space<vmem>>, vector<8x128xf32>,
    return
  }
  func.func @transform_0(%arg0: i32) -> (i32, i32) {
    %c0_i32 = arith.constant 0 : i32
    %c0_i32_0 = arith.constant 0 : i32
    return %arg0, %c0_i32 : i32, i32
  }
  func.func @transform_1(%arg0: i32) -> (i32, i32) {
    %c0_i32 = arith.constant 0 : i32
    %c0_i32_0 = arith.constant 0 : i32
    %c0_i32_1 = arith.constant 0 : i32
    return %c0_i32, %c0_i32_0 : i32, i32
  }
  func.func @transform_2(%arg0: i32) -> (i32, i32) {
    %c0_i32 = arith.constant 0 : i32
    %c0_i32_0 = arith.constant 0 : i32
    %c0_i32_1 = arith.constant 0 : i32
    return %c0_i32, %c0_i32_0 : i32, i32
  }
  func.func @transform_3(%arg0: i32) -> (i32, i32) {
    %c0_i32 = arith.constant 0 : i32
    %c0_i32_0 = arith.constant 0 : i32
    %c0_i32_1 = arith.constant 0 : i32
    return %c0_i32, %c0_i32_0 : i32, i32
  }
  func.func @transform_4(%arg0: i32) -> (i32, i32) {
    %c0_i32 = arith.constant 0 : i32
    %c0_i32_0 = arith.constant 0 : i32
    %c0_i32_1 = arith.constant 0 : i32
    return %c0_i32, %c0_i32_0 : i32, i32
  }
  func.func @transform_5(%arg0: i32) -> (i32, i32) {
    %c0_i32 = arith.constant 0 : i32
    %c0_i32_0 = arith.constant 0 : i32
    return %arg0, %c0_i32 : i32, i32
  }
}

</mosaic_0001>

<bundles_post_ra>
// kernel: tpu_custom_call.1
= control target key start
LH: loop header
LB: loop body
LE: loop exit
PB: predicated region body
PF: predicated region fallthrough
CT: control target
= control target key end

     0   :  { %10 = vsyncpa [#allocation3], 0  ;;  %s388_s0 = inlined_call_operand.vmem [shape: f32[8,4], index: 0, kind: input, shape index: {}]   ;;  %s389_s1 = inlined_call_operand.vmem [shape: f32[4,32], index: 1, kind: input, shape index: {}]   ;;  %s390_s2 = inlined_call_operand.vmem [shape: f32[1,32], index: 2, kind: input, shape index: {}]   ;;  %s391_s3 = inlined_call_operand.hbm [shape: f32[32,128], index: 3, kind: input, shape index: {}]   ;;  %s392_s4 = inlined_call_operand.vmem [shape: f32[1,128], index: 4, kind: input, shape index: {}]   ;;  %s393_s5 = inlined_call_operand.hbm [shape: f32[8,128], index: 5, kind: output, shape index: {}]  }
   0x1   :  { %11 = vsyncpa [#allocation4], 0  ;;  %s315_s18 = smov [#allocation2]   ;;  %s267_s22 = scalar_lea.hbm %s391_s3, 512 }
   0x2   :  { %s23_s19 = sshll.u32 %s315_s18, 4  ;;  %p268_p0 = scmp.ne.s32.totalorder %s391_s3, %s267_s22  ;;  %s24_s19 = int_to_ptr.vmem [resolvable:$true] %s23_s19 }
   0x3   :  { %p271_p1 = scmp.lt.u32.totalorder %s267_s22, %s391_s3 }
   0x5   :  { %p273_p2 = pnand %p271_p1, %p268_p0 }
   0x7   :  { %276 = shalt.err (!%p273_p2)
}
   0x8   :  { %s277_s27 = scalar_lea.vmem %s24_s19, 512  ;;  %p282_p4 = scmp.lt.s32.totalorder %s24_s19, %s24_s19 }
   0x9   :  { %p278_p3 = scmp.ne.s32.totalorder %s24_s19, %s277_s27  ;;  %p283_p5 = scmp.lt.s32.totalorder %s277_s27, %s277_s27 }
   0xb   :  { %p284_p6 = por %p283_p5, %p282_p4 }
   0xd   :  { %p285_p7 = pnand %p284_p6, %p278_p3 }
   0xf   :  { %288 = shalt.err (!%p285_p7)
}
  0x10   :  { %s316_s28 = smov 128   ;;  %s317_s29 = smov 8  }
  0x11   :  { %29 = dma.hbm_to_vmem [thread:$0]  %s391_s3, 512, %s24_s19, [#allocation3], %s316_s28, %s316_s28, %s317_s29  }
  0x12   :  { %311 = dma.done.wait [#allocation3], 512  }
  0x13   :  { %312 = vsyncadd [#allocation3], 4294966784  ;;  %v318_v0 = vmov 0.0   ;;  %vm319_vm0 = vmmov 0   ;;  %v320_v1 = vmov 0.0|0.0   ;;  %vm48_vm1 = vcmask 1043456  }
  0x14   :  { %238 = vmatprep.subr.mxu0 %v318_v0  ;;  %240 = vmatprep.mubr.msk.f32.mxu0 %vm319_vm0, %v318_v0  ;;  %vm44_vm2 = vcmask 31744   ;;  %v36_v2 = vld [vmem:[%s389_s1] sm:$0xf]  ;;  %v126_v5 = vld [vmem:[#allocation2 + $0x8] sm:$0xff]  ;;  %v127_v7 = vld [vmem:[#allocation2 + $0x10] sm:$0xff]  ;;  %vm136_vm4 = vcmask 261120  }
  0x15   :  { %254 = vmatprep.subr.bf16.mxu1 %v320_v1  ;;  %251 = vmatprep.mubr.msk.f32.mxu1 %vm319_vm0, %v318_v0  ;;  %v35_v3 = vld [vmem:[%s388_s0] sm:$0xff]  ;;  %v128_v8 = vld [vmem:[#allocation2 + $0x18] sm:$0xff]  ;;  %s321_s12 = smov [#allocation5]  }
  0x16   :  { %v125_v4 = vld [vmem:[#allocation2] sm:$0xff]  ;;  %239 = vmatpush3.msk.msra.mxu0 %vm48_vm1, %v36_v2  ;;  %v258_v9 = vpack.c.bf16 %v128_v8, %v127_v7  ;;  %s217_s13 = sshll.u32 %s321_s12, 4  ;;  %s218_s13 = int_to_ptr.vmem [resolvable:$true] %s217_s13 }
  0x17   :  { %241 = vmatmul.mubr.msk.f32.vlgmr.msra.gmra.mrb[0].mxu0 %vm44_vm2, %v35_v3  ;;  %v255_v6 = vpack.c.bf16 %v126_v5, %v125_v4  ;;  %v226_v10 = vld [vmem:[%s390_s2] ss:$0 sm:$0xff]  ;;  %s289_s2 = scalar_lea.vmem %s218_s13, 128  ;;  %p294_p9 = scmp.lt.s32.totalorder %s218_s13, %s218_s13 }
  0x18   :  { %v229_v16 = vld [vmem:[%s392_s4] ss:$0 sm:$0xff]  ;;  %p290_p8 = scmp.ne.s32.totalorder %s218_s13, %s289_s2  ;;  %p295_p10 = scmp.lt.s32.totalorder %s289_s2, %s289_s2 }
  0x19   :  { %256 = vmatpush3.bf16.msra.mxu1 %v255_v6 }
  0x1a   :  { %257 = vmatprep.subr.bf16.mxu1 %v320_v1  ;;  %p296_p11 = por %p295_p10, %p294_p9 }
  0x1c   :  { %p297_p12 = pnand %p296_p11, %p290_p8 }
  0x1d   :  { %259 = vmatpush3.bf16.msra.mxu1 %v258_v9 }
  0xea   :  { %v118_v11 = vpop.f32.mrb[0].mxu0 }
  0xeb   :  { %v119_v12 = vadd.f32 %v226_v10, %v118_v11  ;;  %v242_v13 = vpop.f32.mrb[1].mxu0 }
  0xed   :  { %vm122_vm3 = vcmp.ge.f32.partialorder %v119_v12, 0.0  ;;  %v123_v14 = vmul.f32 0.01, %v119_v12 }
  0xef   :  { %v124_v15 = vsel %vm122_vm3, %v119_v12, %v123_v14 }
  0xf0   :  { %252 = vmatmul.mubr.msk.f32.vlgmr.msra.gmra.mrb[0].mxu1 %vm136_vm4, %v124_v15 }
 0x1c3   :  { %v206_v17 = vpop.f32.mrb[0].mxu1 }
 0x1c4   :  { %v207_v18 = vadd.f32 %v229_v16, %v206_v17  ;;  %v253_v19 = vpop.f32.mrb[1].mxu1 }
 0x1c6   :  { %210 = vst [vmem:[#allocation5] sm:$0xff] %v207_v18 }
 0x1c7   :  { %300 = shalt.err (!%p297_p12)
}
 0x1c8   :  { %s301_s16 = scalar_lea.hbm %s393_s5, 128 }
 0x1c9   :  { %p302_p13 = scmp.ne.s32.totalorder %s393_s5, %s301_s16  ;;  %p305_p0 = scmp.lt.u32.totalorder %s301_s16, %s393_s5 }
 0x1cb   :  { %p307_p1 = pnand %p305_p0, %p302_p13 }
 0x1cd   :  { %310 = shalt.err (!%p307_p1)
}
 0x1ce   :  { %220 = dma.vmem_to_hbm [thread:$0]  %s218_s13, 128, %s393_s5, [#allocation4]  }
 0x1cf   :  { %313 = dma.done.wait [#allocation4], 128  }
 0x1d0   :  { %314 = vsyncadd [#allocation4], 4294967168 }
 0x1d1   :  { %224 = vsyncpa [#allocation3], 1 }
 0x1d2   :  { %225 = vsyncpa [#allocation4], 1 }

</bundles_post_ra>
